<compile_context>
chip_gen: v6e
topology: v6e:2x2x1
jax: 0.10.0
libtpu: 0.0.40
codegen_flags: <defaults>
</compile_context>

<pallas_src>
import functools

import numpy as np
import jax
import jax.numpy as jnp
from jax import lax
from jax.experimental import pallas as pl
from jax.experimental.pallas import tpu as pltpu


# ----------------------------------------------------------------------------
# Per-generation resource configuration
# ----------------------------------------------------------------------------
@functools.lru_cache(maxsize=None)
def _tpu_config():
    """VMEM budgets (bytes) chosen per chip generation.

    128 MiB VMEM parts (v5e/v6e/v5p): big budgets -> full-K resident weights
    (nk == 1 for every real layer), single TensorCore so no block-splitting cap.
    64 MiB parts (v7x-class) or unknown: conservative budgets, keep >=2 blocks
    on a parallel grid axis so both TensorCores get work.
    """
    vmem_bytes = 0
    try:
        info = pltpu.get_tpu_info()
        vmem_bytes = int(getattr(info, "vmem_capacity_bytes", 0))
    except Exception:
        vmem_bytes = 0
    if vmem_bytes >= (100 << 20):
        return {"limit": 100 << 20, "w": 32 << 20, "a": 8 << 20, "o": 8 << 20,
                "multi_tc": False}
    return {"limit": 56 << 20, "w": 12 << 20, "a": 4 << 20, "o": 4 << 20,
            "multi_tc": True}


def _largest_divisor(n, cap):
    """Largest d with d | n and d <= cap (cap clamped to [1, n])."""
    cap = int(max(1, min(cap, n)))
    for d in range(cap, 0, -1):
        if n % d == 0:
            return d
    return 1


def _choose_tk(K, N, itemsize, budget):
    """Largest K tile whose 3-tap weight set (wA: tk x 2N, w0: tk x N) fits
    `budget`.  Multiples of 256 preferred (256-wide MXU on v6e/v7x), then 128.
    Falls back to full K (the block constraint requires tk % 128 == 0 or
    tk == K, so a non-aligned partial tile is never produced)."""
    cap = budget // max(1, 3 * N * itemsize)
    if K <= cap:
        return K
    for step in (256, 128):
        d = (cap // step) * step
        while d >= step:
            if K % d == 0:
                return d
            d -= step
    return K


def _choose_th(H, cap):
    """H tile: full H if it fits, else the largest multiple-of-8 divisor <= cap
    (keeps the block legal and the in-kernel reshapes layout-free).  If none
    exists, fall back to full H (may exceed the soft budget, never illegal)."""
    if H <= cap:
        return H
    for d in range(min(int(cap), H), 0, -1):
        if H % d == 0 and d % 8 == 0:
            return d
    return H


# ----------------------------------------------------------------------------
# In-kernel helpers
# ----------------------------------------------------------------------------
def _shift_rows_up(x, rows, period):
    """For a 2-D (M, C) array viewed as groups of `period` rows, return y with
    y[r] = x[r + rows] inside each group and 0 in the vacated last `rows` rows.
    Uses an XLU sublane roll + VPU mask (no activation-copy concatenate)."""
    m = x.shape[0]
    if rows >= period:
        return jnp.zeros_like(x)
    if m % 8 == 0:
        rolled = pltpu.roll(x, (m - rows) % m, 0)          # roll up by `rows`
        r = lax.broadcasted_iota(jnp.int32, (m, 1), 0)
        keep = (r % period) < (period - rows)
        return jnp.where(keep, rolled, jnp.zeros_like(rolled))
    # Rare unaligned-sublane fallback: explicit slice + zero pad (correct always).
    g = m // period
    x3 = x.reshape(g, period, x.shape[1])
    sh = jnp.concatenate(
        [x3[:, rows:, :], jnp.zeros((g, rows, x.shape[1]), x.dtype)], axis=1)
    return sh.reshape(m, x.shape[1])


# ----------------------------------------------------------------------------
# Kernel A: deconv axis adjacent to channels (H pass, layout (B, L, K)).
# ----------------------------------------------------------------------------
def _deconv1d_last_kernel(a_ref, wA_ref, w0_ref, b2_ref, out_ref, *acc,
                          L, N, nk, shift_product):
    """a: (tb, L, tk); wA: (tk, 2N) = [W_even | W_odd]; w0: (tk, N) shifted tap;
    b2: (1, 2N); out: (tb, L, 2N) = [even rows | odd rows] along channels."""
    tb, _, tk = a_ref.shape
    m = tb * L
    a2 = a_ref[...].reshape(m, tk)

    out12 = jnp.dot(a2, wA_ref[...], preferred_element_type=jnp.float32)
    if L == 1:
        p_sh = None                         # x[m+1] out of range -> no contribution
    elif shift_product:
        p_sh = _shift_rows_up(
            jnp.dot(a2, w0_ref[...], preferred_element_type=jnp.float32), 1, L)
    else:
        p_sh = jnp.dot(_shift_rows_up(a2, 1, L), w0_ref[...],
                       preferred_element_type=jnp.float32)

    def _store(even, odd):
        if N % 128 == 0:                    # lane-aligned halves -> two slice stores
            out_ref[:, :, :N] = even.reshape(tb, L, N).astype(out_ref.dtype)
            out_ref[:, :, N:] = odd.reshape(tb, L, N).astype(out_ref.dtype)
        else:                               # small N: one store of the concat block
            res = jnp.concatenate([even, odd], axis=-1)
            out_ref[...] = res.reshape(tb, L, 2 * N).astype(out_ref.dtype)

    def _finalize(full12, odd_extra):
        biased = full12 + b2_ref[...].astype(jnp.float32)
        even = jnp.maximum(biased[:, :N], 0.0)
        odd = biased[:, N:]
        if odd_extra is not None:
            odd = odd + odd_extra
        _store(even, jnp.maximum(odd, 0.0))

    if nk == 1:
        _finalize(out12, p_sh)
        return

    acc_ref = acc[0]
    k = pl.program_id(1)

    @pl.when(k == 0)
    def _():
        acc_ref[...] = jnp.zeros_like(acc_ref)

    if p_sh is None:
        acc_ref[...] += out12
    elif N % 128 == 0:
        acc_ref[:, :N] += out12[:, :N]
        acc_ref[:, N:] += out12[:, N:] + p_sh
    else:
        acc_ref[...] += out12 + jnp.concatenate(
            [jnp.zeros_like(p_sh), p_sh], axis=-1)

    @pl.when(k == nk - 1)
    def _():
        _finalize(acc_ref[...], None)


def _deconv_last_axis(x3, wA, w0, b2, *, weight_budget=None):
    """x3: (B, L, K) -> (B, L, 2N).  out[..., :N] = even rows, [..., N:] = odd."""
    B, L, K = x3.shape
    N = w0.shape[1]
    isz = x3.dtype.itemsize
    cfg = _tpu_config()
    wb = cfg["w"] if weight_budget is None else weight_budget

    tk = _choose_tk(K, N, isz, wb)
    nk = K // tk
    tb_cap = max(1, min(cfg["a"] // max(1, L * tk * isz),
                        cfg["o"] // max(1, L * 2 * N * isz)))
    if cfg["multi_tc"] and B > 1:           # >=2 blocks on the parallel axis (2 TCs)
        tb_cap = min(tb_cap, max(1, B // 2))
    tb = _largest_divisor(B, tb_cap)
    nb = B // tb

    kernel = functools.partial(_deconv1d_last_kernel, L=L, N=N, nk=nk,
                               shift_product=(N <= tk))
    scratch = [] if nk == 1 else [pltpu.VMEM((tb * L, 2 * N), jnp.float32)]
    return pl.pallas_call(
        kernel,
        out_shape=jax.ShapeDtypeStruct((B, L, 2 * N), x3.dtype),
        grid_spec=pltpu.PrefetchScalarGridSpec(
            num_scalar_prefetch=0,
            grid=(nb, nk),
            in_specs=[
                pl.BlockSpec((tb, L, tk), lambda i, k: (i, 0, k)),
                pl.BlockSpec((tk, 2 * N), lambda i, k: (k, 0)),
                pl.BlockSpec((tk, N), lambda i, k: (k, 0)),
                pl.BlockSpec((1, 2 * N), lambda i, k: (0, 0)),
            ],
            out_specs=pl.BlockSpec((tb, L, 2 * N), lambda i, k: (i, 0, 0)),
            scratch_shapes=scratch),
        compiler_params=pltpu.CompilerParams(
            dimension_semantics=("parallel", "arbitrary"),
            vmem_limit_bytes=cfg["limit"]),
    )(x3, wA, w0, b2)


# ----------------------------------------------------------------------------
# Kernel B: deconv axis is the block's W axis (W pass, layout (n, W, H, K)).
# ----------------------------------------------------------------------------
def _deconv1d_outer_kernel(a_ref, wA_ref, w0_ref, b2_ref, out_ref, *acc,
                           N, nk, shift_product):
    """a: (1, Wd, th, tk); out: (1, Wd, 2, th, N) with even at index 0, odd 1."""
    _, Wd, th, tk = a_ref.shape
    m = Wd * th
    a2 = a_ref[...].reshape(m, tk)

    out12 = jnp.dot(a2, wA_ref[...], preferred_element_type=jnp.float32)
    if Wd == 1:
        p_sh = None
    elif shift_product:
        p_sh = _shift_rows_up(
            jnp.dot(a2, w0_ref[...], preferred_element_type=jnp.float32), th, m)
    else:
        p_sh = jnp.dot(_shift_rows_up(a2, th, m), w0_ref[...],
                       preferred_element_type=jnp.float32)

    def _store(even, odd):
        if N % 128 == 0:                    # direct slice stores, no block shuffle
            out_ref[:, :, 0:1, :, :] = even.reshape(1, Wd, 1, th, N).astype(out_ref.dtype)
            out_ref[:, :, 1:2, :, :] = odd.reshape(1, Wd, 1, th, N).astype(out_ref.dtype)
        else:
            blk = jnp.concatenate([even.reshape(Wd, 1, th, N),
                                   odd.reshape(Wd, 1, th, N)], axis=1)
            out_ref[...] = blk.reshape(1, Wd, 2, th, N).astype(out_ref.dtype)

    def _finalize(full12, odd_extra):
        biased = full12 + b2_ref[...].astype(jnp.float32)
        even = jnp.maximum(biased[:, :N], 0.0)
        odd = biased[:, N:]
        if odd_extra is not None:
            odd = odd + odd_extra
        _store(even, jnp.maximum(odd, 0.0))

    if nk == 1:
        _finalize(out12, p_sh)
        return

    acc_ref = acc[0]
    k = pl.program_id(2)

    @pl.when(k == 0)
    def _():
        acc_ref[...] = jnp.zeros_like(acc_ref)

    if p_sh is None:
        acc_ref[...] += out12
    elif N % 128 == 0:
        acc_ref[:, :N] += out12[:, :N]
        acc_ref[:, N:] += out12[:, N:] + p_sh
    else:
        acc_ref[...] += out12 + jnp.concatenate(
            [jnp.zeros_like(p_sh), p_sh], axis=-1)

    @pl.when(k == nk - 1)
    def _():
        _finalize(acc_ref[...], None)


def _deconv_outer_axis(x4, wA, w0, b2, *, weight_budget=None):
    """x4: (n, W, H, K) -> (n, W, 2, H, N) (views as (n, 2W, H, N))."""
    n, Wd, H, K = x4.shape
    N = w0.shape[1]
    isz = x4.dtype.itemsize
    cfg = _tpu_config()
    wb = cfg["w"] if weight_budget is None else weight_budget

    tk = _choose_tk(K, N, isz, wb)
    nk = K // tk
    th_cap = max(1, min(cfg["a"] // max(1, Wd * tk * isz),
                        cfg["o"] // max(1, Wd * 2 * N * isz)))
    if cfg["multi_tc"] and n == 1 and H >= 16:   # keep >=2 blocks for 2 TCs
        th_cap = min(th_cap, max(8, H // 2))
    th = _choose_th(H, th_cap)
    nh = H // th

    kernel = functools.partial(_deconv1d_outer_kernel, N=N, nk=nk,
                               shift_product=(N <= tk))
    scratch = [] if nk == 1 else [pltpu.VMEM((Wd * th, 2 * N), jnp.float32)]
    return pl.pallas_call(
        kernel,
        out_shape=jax.ShapeDtypeStruct((n, Wd, 2, H, N), x4.dtype),
        grid_spec=pltpu.PrefetchScalarGridSpec(
            num_scalar_prefetch=0,
            grid=(n, nh, nk),
            in_specs=[
                pl.BlockSpec((1, Wd, th, tk), lambda bi, j, k: (bi, 0, j, k)),
                pl.BlockSpec((tk, 2 * N), lambda bi, j, k: (k, 0)),
                pl.BlockSpec((tk, N), lambda bi, j, k: (k, 0)),
                pl.BlockSpec((1, 2 * N), lambda bi, j, k: (0, 0)),
            ],
            out_specs=pl.BlockSpec((1, Wd, 2, th, N),
                                   lambda bi, j, k: (bi, 0, 0, j, 0)),
            scratch_shapes=scratch),
        compiler_params=pltpu.CompilerParams(
            dimension_semantics=("parallel", "parallel", "arbitrary"),
            vmem_limit_bytes=cfg["limit"]),
    )(x4, wA, w0, b2)


# ----------------------------------------------------------------------------
# Directional transposed convs (+ ReLU) in W-major (n, W, H, C) layout
# ----------------------------------------------------------------------------
def deconv_relu_h(x_whc, w, b):
    """deconv_h + ReLU.  x_whc: (n, W, H, Cin); w: PyTorch weight (Cin, Cmid, 3, 1).
    Returns (n, W, 2H, Cmid)."""
    n, Wd, H, cin = x_whc.shape
    cmid = w.shape[1]
    w0 = w[:, :, 0, 0]
    wA = jnp.concatenate([w[:, :, 1, 0], w[:, :, 2, 0]], axis=1)   # (Cin, 2*Cmid)
    b2 = jnp.concatenate([b, b]).reshape(1, 2 * cmid)
    out = _deconv_last_axis(x_whc.reshape(n * Wd, H, cin), wA, w0, b2)
    # (n*W, H, 2*Cmid) -> (n, W, 2H, Cmid): pure view reshape (free interleave).
    return out.reshape(n, Wd, 2 * H, cmid)


def deconv_relu_w(x_whc, w, b):
    """deconv_w + ReLU.  x_whc: (n, W, H, Cmid); w: PyTorch weight (Cmid, Cout, 1, 3).
    Returns (n, 2W, H, Cout)."""
    n, Wd, H, _ = x_whc.shape
    cout = w.shape[1]
    w0 = w[:, :, 0, 0]
    wA = jnp.concatenate([w[:, :, 0, 1], w[:, :, 0, 2]], axis=1)   # (Cmid, 2*Cout)
    b2 = jnp.concatenate([b, b]).reshape(1, 2 * cout)
    out = _deconv_outer_axis(x_whc, wA, w0, b2)
    # (n, W, 2, H, Cout) -> (n, 2W, H, Cout): pure view reshape (free interleave).
    return out.reshape(n, 2 * Wd, H, cout)


# ----------------------------------------------------------------------------
# DecomposedFcnDecoder
# ----------------------------------------------------------------------------
def init_decomposed_fcn_decoder(key, num_features=1024, out_chans=64,
                                channel_spec=None, dtype=jnp.float32):
    """channel_spec defaults to the exact PyTorch module configuration."""
    if channel_spec is None:
        channel_spec = [(num_features, 1024, 2048), (2048, 1024, 512),
                        (512, 512, 256), (256, 256, 128),
                        (128, 128, out_chans)]
    params = []
    for cin, cmid, cout in channel_spec:
        key, k1, k2, k3, k4 = jax.random.split(key, 5)
        s_h = 1.0 / np.sqrt(cin * 3)
        s_w = 1.0 / np.sqrt(cmid * 3)
        params.append({
            "wh": jax.random.uniform(k1, (cin, cmid, 3, 1), dtype, -s_h, s_h),
            "bh": jax.random.uniform(k2, (cmid,), dtype, -s_h, s_h),
            "ww": jax.random.uniform(k3, (cmid, cout, 1, 3), dtype, -s_w, s_w),
            "bw": jax.random.uniform(k4, (cout,), dtype, -s_w, s_w),
        })
    return params


def decomposed_fcn_decoder(params, x_nchw, *, compute_dtype=None):
    """Forward pass. Input/output layout is NCHW like the PyTorch module.
    compute_dtype=jnp.bfloat16 optionally casts matmul inputs (f32 accumulation)
    -- numerics-changing, off by default."""
    # Single layout change to W-major (n, W, H, C) for the whole decoder.
    # (The boundary transposes are XLA ops; they can be elided if the producer/
    #  consumer accept the W-major layout.)
    x = jnp.transpose(x_nchw, (0, 3, 2, 1))
    if compute_dtype is not None:
        x = x.astype(compute_dtype)
    for p in params:
        wh, bh, ww, bw = p["wh"], p["bh"], p["ww"], p["bw"]
        if compute_dtype is not None:
            wh, bh, ww, bw = (a.astype(compute_dtype) for a in (wh, bh, ww, bw))
        x = deconv_relu_h(x, wh, bh)        # H -> 2H, ReLU
        x = deconv_relu_w(x, ww, bw)        # W -> 2W, ReLU
    out = jnp.transpose(x, (0, 3, 2, 1))    # (n, W, H, C) -> NCHW
    return out.astype(x_nchw.dtype)


# ----------------------------------------------------------------------------
# Pure-JAX references for correctness checking
# ----------------------------------------------------------------------------
def _conv_transpose2d_ref(x, w, b, stride, padding, output_padding):
    kh, kw = w.shape[2], w.shape[3]
    rhs = jnp.flip(w, axis=(2, 3)).transpose(1, 0, 2, 3)   # -> OIHW
    (sh, sw), (ph, pw), (oph, opw) = stride, padding, output_padding
    out = lax.conv_general_dilated(
        x, rhs, window_strides=(1, 1),
        padding=((kh - 1 - ph, kh - 1 - ph + oph),
                 (kw - 1 - pw, kw - 1 - pw + opw)),
        lhs_dilation=(sh, sw), rhs_dilation=(1, 1),
        dimension_numbers=("NCHW", "OIHW", "NCHW"))
    return out + b[None, :, None, None]


def decoder_ref(params, x_nchw):
    x = x_nchw
    for p in params:
        x = jax.nn.relu(_conv_transpose2d_ref(x, p["wh"], p["bh"],
                                              (2, 1), (1, 0), (1, 0)))
        x = jax.nn.relu(_conv_transpose2d_ref(x, p["ww"], p["bw"],
                                              (1, 2), (0, 1), (0, 1)))
    return x


def _ref_deconv1d_last(x3, w0, w1, w2, b):
    x_next = jnp.concatenate([x3[:, 1:], jnp.zeros_like(x3[:, :1])], axis=1)
    even = jax.nn.relu(jnp.einsum('blk,kn->bln', x3, w1) + b)
    odd = jax.nn.relu(jnp.einsum('blk,kn->bln', x3, w2)
                      + jnp.einsum('blk,kn->bln', x_next, w0) + b)
    return jnp.concatenate([even, odd], axis=-1)


def _ref_deconv1d_outer(x4, w0, w1, w2, b):
    x_next = jnp.concatenate([x4[:, 1:], jnp.zeros_like(x4[:, :1])], axis=1)
    even = jax.nn.relu(jnp.einsum('bwhk,kn->bwhn', x4, w1) + b)
    odd = jax.nn.relu(jnp.einsum('bwhk,kn->bwhn', x4, w2)
                      + jnp.einsum('bwhk,kn->bwhn', x_next, w0) + b)
    return jnp.stack([even, odd], axis=2)   # (n, W, 2, H, N)


if __name__ == "__main__":
    key = jax.random.PRNGKey(0)

    # --- unit check kernel A: K tiled (nk=2), shift-the-product branch --------
    k1, k2, k3, k4, k5, k6 = jax.random.split(key, 6)
    a3 = jax.random.normal(k1, (4, 8, 256), jnp.float32)
    wt = 0.05 * jax.random.normal(k2, (3, 256, 128), jnp.float32)
    bt = 0.05 * jax.random.normal(k3, (128,), jnp.float32)
    wA = jnp.concatenate([wt[1], wt[2]], axis=1)
    b2 = jnp.concatenate([bt, bt]).reshape(1, 256)
    got = _deconv_last_axis(a3, wA, wt[0], b2, weight_budget=200_000)
    want = _ref_deconv1d_last(a3, wt[0], wt[1], wt[2], bt)
    np.testing.assert_allclose(np.asarray(got), np.asarray(want),
                               rtol=5e-4, atol=5e-4)

    # --- unit check kernel B: K tiled (nk=2), shift-the-activation branch -----
    a4 = jax.random.normal(k4, (2, 4, 8, 256), jnp.float32)
    wt2 = 0.05 * jax.random.normal(k5, (3, 256, 256), jnp.float32)
    bt2 = 0.05 * jax.random.normal(k6, (256,), jnp.float32)
    wA2 = jnp.concatenate([wt2[1], wt2[2]], axis=1)
    b22 = jnp.concatenate([bt2, bt2]).reshape(1, 512)
    got = _deconv_outer_axis(a4, wA2, wt2[0], b22, weight_budget=400_000)
    want = _ref_deconv1d_outer(a4, wt2[0], wt2[1], wt2[2], bt2)
    np.testing.assert_allclose(np.asarray(got), np.asarray(want),
                               rtol=5e-4, atol=5e-4)

    # --- end-to-end decoder (small config, same 5-block x32/x32 upsampling) ---
    num_features, out_chans = 32, 8
    channel_spec = [(num_features, 32, 64), (64, 32, 16), (16, 16, 16),
                    (16, 16, 16), (16, 16, out_chans)]

    kp, kx = jax.random.split(key)
    params = init_decomposed_fcn_decoder(kp, channel_spec=channel_spec)
    x = jax.random.normal(kx, (2, num_features, 4, 4), jnp.float32)

    out = jax.block_until_ready(jax.jit(decomposed_fcn_decoder)(params, x))
    assert out.shape == (2, out_chans, 4 * 32, 4 * 32), out.shape

    ref = jax.block_until_ready(decoder_ref(params, x))
    np.testing.assert_allclose(np.asarray(out), np.asarray(ref),
                               rtol=5e-4, atol=5e-4)
    print("KERNEL_OK")
</pallas_src>

<mosaic_0001>
module attributes {stable_mosaic.version = 11 : i64} {
  func.func @_deconv1d_last_kernel(%arg0: i32, %arg1: i32, %arg2: memref<2x8x128xf32, #tpu.memory_space<vmem>>, %arg3: memref<128x256xf32, #tpu.memory_space<vmem>>, %arg4: memref<128x128xf32, #tpu.memory_space<vmem>>, %arg5: memref<1x256xf32, #tpu.memory_space<vmem>>, %arg6: memref<2x8x256xf32, #tpu.memory_space<vmem>>, %arg7: memref<16x256xf32, #tpu.memory_space<vmem>>) attributes {dimension_semantics = [#tpu.dimension_semantics<parallel>, #tpu.dimension_semantics<arbitrary>], iteration_bounds = array<i64: 2, 2>, scalar_prefetch = 0 : i64, scratch_operands = 1 : i64, tpu.core_type = #tpu.core_type<tc>, window_params = [{transform_indices = @transform_0, window_bounds = array<i64: 2, 8, 128>}, {transform_indices = @transform_1, window_bounds = array<i64: 128, 256>}, {transform_indices = @transform_2, window_bounds = array<i64: 128, 128>}, {pipeline_mode = #tpu.pipeline_mode<synchronous>, transform_indices = @transform_3, window_bounds = array<i64: 1, 256>}, {transform_indices = @transform_4, window_bounds = array<i64: 2, 8, 256>}]} {
    %c0 = arith.constant 0 : index
    %c0_0 = arith.constant 0 : index
    %c0_1 = arith.constant 0 : index
    %0 = vector.load %arg2[%c0, %c0_0, %c0_1] : memref<2x8x128xf32, #tpu.memory_space<vmem>>, vector<2x8x128xf32>
    %1 = vector.shape_cast %0 : vector<2x8x128xf32> to vector<16x128xf32>
    %c0_2 = arith.constant 0 : index
    %c0_3 = arith.constant 0 : index
    %2 = vector.load %arg3[%c0_2, %c0_3] : memref<128x256xf32, #tpu.memory_space<vmem>>, vector<128x256xf32>
    %cst = arith.constant dense<0.000000e+00> : vector<16x256xf32>
    %3 = tpu.matmul %1, %2, %cst {dimension_numbers = #tpu.dot_dimension_numbers<[1], [0], [0], [1], [0, 0, 1, 1], [], []>} : vector<16x128xf32>, vector<128x256xf32>, vector<16x256xf32> -> vector<16x256xf32>
    %c0_4 = arith.constant 0 : index
    %c0_5 = arith.constant 0 : index
    %4 = vector.load %arg4[%c0_4, %c0_5] : memref<128x128xf32, #tpu.memory_space<vmem>>, vector<128x128xf32>
    %cst_6 = arith.constant dense<0.000000e+00> : vector<16x128xf32>
    %5 = tpu.matmul %1, %4, %cst_6 {dimension_numbers = #tpu.dot_dimension_numbers<[1], [0], [0], [1], [0, 0, 1, 1], [], []>} : vector<16x128xf32>, vector<128x128xf32>, vector<16x128xf32> -> vector<16x128xf32>
    %c15_i32 = arith.constant 15 : i32
    %6 = tpu.dynamic_rotate %5 by %c15_i32 dim 0 : vector<16x128xf32>, i32 -> vector<16x128xf32>
    %7 = tpu.iota {dimensions = array<i32: 0>} : vector<16x1xi32>
    %c8_i32 = arith.constant 8 : i32
    %c0_i32 = arith.constant 0 : i32
    %8 = arith.cmpi eq, %c8_i32, %c0_i32 : i32
    %c1_i32 = arith.constant 1 : i32
    %9 = arith.select %8, %c1_i32, %c8_i32 : i32
    %10 = vector.broadcast %9 : i32 to vector<16x1xi32>
    %11 = arith.remsi %7, %10 : vector<16x1xi32>
    %c0_i32_7 = arith.constant 0 : i32
    %12 = vector.broadcast %c0_i32_7 : i32 to vector<16x1xi32>
    %13 = arith.cmpi ne, %11, %12 : vector<16x1xi32>
    %c0_i32_8 = arith.constant 0 : i32
    %14 = vector.broadcast %c0_i32_8 : i32 to vector<16x1xi32>
    %15 = arith.cmpi slt, %11, %14 : vector<16x1xi32>
    %c0_i32_9 = arith.constant 0 : i32
    %16 = arith.cmpi slt, %9, %c0_i32_9 : i32
    %17 = vector.broadcast %16 : i1 to vector<16x1xi1>
    %18 = vector.broadcast %17 : vector<16x1xi1> to vector<16x1xi1>
    %19 = arith.xori %15, %18 : vector<16x1xi1>
    %20 = arith.andi %19, %13 : vector<16x1xi1>
    %21 = vector.broadcast %9 : i32 to vector<16x1xi32>
    %22 = arith.addi %11, %21 : vector<16x1xi32>
    %23 = arith.select %20, %22, %11 : vector<16x1xi1>, vector<16x1xi32>
    %c7_i32 = arith.constant 7 : i32
    %24 = vector.broadcast %c7_i32 : i32 to vector<16x1xi32>
    %25 = arith.cmpi slt, %23, %24 : vector<16x1xi32>
    %cst_10 = arith.constant 0.000000e+00 : f32
    %26 = vector.broadcast %cst_10 : f32 to vector<16x128xf32>
    %27 = vector.shape_cast %25 : vector<16x1xi1> to vector<16x1xi1>
    %28 = vector.broadcast %27 : vector<16x1xi1> to vector<16x128xi1>
    %29 = arith.select %28, %6, %26 : vector<16x128xi1>, vector<16x128xf32>
    %c0_i32_11 = arith.constant 0 : i32
    %30 = arith.cmpi eq, %arg1, %c0_i32_11 : i32
    %31 = arith.extui %30 : i1 to i32
    %c0_i32_12 = arith.constant 0 : i32
    %32 = arith.cmpi ne, %31, %c0_i32_12 : i32
    scf.if %32 {
      %cst_22 = arith.constant 0.000000e+00 : f32
      %45 = vector.broadcast %cst_22 : f32 to vector<16x256xf32>
      %c0_23 = arith.constant 0 : index
      %c0_24 = arith.constant 0 : index
      %46 = vector.load %arg7[%c0_23, %c0_24] : memref<16x256xf32, #tpu.memory_space<vmem>>, vector<16x256xf32>
      tpu.vector_store %arg7[%c0_23, %c0_24], %45 {strides = array<i32>} : memref<16x256xf32, #tpu.memory_space<vmem>>, vector<16x256xf32>,
    } else {
    }
    %c0_13 = arith.constant 0 : index
    %c0_14 = arith.constant 0 : index
    %33 = vector.load %arg7[%c0_13, %c0_14] : memref<16x256xf32, #tpu.memory_space<vmem>>, vector<16x128xf32>
    %34 = vector.extract_strided_slice %3 {offsets = [0, 0], sizes = [16, 128], strides = [1, 1]} : vector<16x256xf32> to vector<16x128xf32>
    %35 = arith.addf %33, %34 : vector<16x128xf32>
    %c0_15 = arith.constant 0 : index
    %c0_16 = arith.constant 0 : index
    %36 = vector.load %arg7[%c0_15, %c0_16] : memref<16x256xf32, #tpu.memory_space<vmem>>, vector<16x128xf32>
    tpu.vector_store %arg7[%c0_15, %c0_16], %35 {strides = array<i32>} : memref<16x256xf32, #tpu.memory_space<vmem>>, vector<16x128xf32>,
    %c0_17 = arith.constant 0 : index
    %c128 = arith.constant 128 : index
    %37 = vector.load %arg7[%c0_17, %c128] : memref<16x256xf32, #tpu.memory_space<vmem>>, vector<16x128xf32>
    %38 = vector.extract_strided_slice %3 {offsets = [0, 128], sizes = [16, 128], strides = [1, 1]} : vector<16x256xf32> to vector<16x128xf32>
    %39 = arith.addf %38, %29 : vector<16x128xf32>
    %40 = arith.addf %37, %39 : vector<16x128xf32>
    %c0_18 = arith.constant 0 : index
    %c128_19 = arith.constant 128 : index
    %41 = vector.load %arg7[%c0_18, %c128_19] : memref<16x256xf32, #tpu.memory_space<vmem>>, vector<16x128xf32>
    tpu.vector_store %arg7[%c0_18, %c128_19], %40 {strides = array<i32>} : memref<16x256xf32, #tpu.memory_space<vmem>>, vector<16x128xf32>,
    %c1_i32_20 = arith.constant 1 : i32
    %42 = arith.cmpi eq, %arg1, %c1_i32_20 : i32
    %43 = arith.extui %42 : i1 to i32
    %c0_i32_21 = arith.constant 0 : i32
    %44 = arith.cmpi ne, %43, %c0_i32_21 : i32
    scf.if %44 {
      %c0_22 = arith.constant 0 : index
      %c0_23 = arith.constant 0 : index
      %45 = vector.load %arg7[%c0_22, %c0_23] : memref<16x256xf32, #tpu.memory_space<vmem>>, vector<16x256xf32>
      %c0_24 = arith.constant 0 : index
      %c0_25 = arith.constant 0 : index
      %46 = vector.load %arg5[%c0_24, %c0_25] : memref<1x256xf32, #tpu.memory_space<vmem>>, vector<1x256xf32>
      %47 = vector.broadcast %46 : vector<1x256xf32> to vector<16x256xf32>
      %48 = arith.addf %45, %47 : vector<16x256xf32>
      %49 = vector.extract_strided_slice %48 {offsets = [0, 0], sizes = [16, 128], strides = [1, 1]} : vector<16x256xf32> to vector<16x128xf32>
      %cst_26 = arith.constant 0.000000e+00 : f32
      %50 = vector.broadcast %cst_26 : f32 to vector<16x128xf32>
      %51 = arith.maximumf %49, %50 : vector<16x128xf32>
      %52 = vector.extract_strided_slice %48 {offsets = [0, 128], sizes = [16, 128], strides = [1, 1]} : vector<16x256xf32> to vector<16x128xf32>
      %cst_27 = arith.constant 0.000000e+00 : f32
      %53 = vector.broadcast %cst_27 : f32 to vector<16x128xf32>
      %54 = arith.maximumf %52, %53 : vector<16x128xf32>
      %55 = vector.shape_cast %51 : vector<16x128xf32> to vector<2x8x128xf32>
      %c0_28 = arith.constant 0 : index
      %c0_29 = arith.constant 0 : index
      %c0_30 = arith.constant 0 : index
      %56 = vector.load %arg6[%c0_28, %c0_29, %c0_30] : memref<2x8x256xf32, #tpu.memory_space<vmem>>, vector<2x8x128xf32>
      tpu.vector_store %arg6[%c0_28, %c0_29, %c0_30], %55 {strides = array<i32>} : memref<2x8x256xf32, #tpu.memory_space<vmem>>, vector<2x8x128xf32>,
      %57 = vector.shape_cast %54 : vector<16x128xf32> to vector<2x8x128xf32>
      %c0_31 = arith.constant 0 : index
      %c0_32 = arith.constant 0 : index
      %c128_33 = arith.constant 128 : index
      %58 = vector.load %arg6[%c0_31, %c0_32, %c128_33] : memref<2x8x256xf32, #tpu.memory_space<vmem>>, vector<2x8x128xf32>
      tpu.vector_store %arg6[%c0_31, %c0_32, %c128_33], %57 {strides = array<i32>} : memref<2x8x256xf32, #tpu.memory_space<vmem>>, vector<2x8x128xf32>,
    } else {
    }
    return
  }
  func.func @transform_0(%arg0: i32, %arg1: i32) -> (i32, i32, i32) {
    %c0_i32 = arith.constant 0 : i32
    %c0_i32_0 = arith.constant 0 : i32
    return %arg0, %c0_i32, %arg1 : i32, i32, i32
  }
  func.func @transform_1(%arg0: i32, %arg1: i32) -> (i32, i32) {
    %c0_i32 = arith.constant 0 : i32
    %c0_i32_0 = arith.constant 0 : i32
    return %arg1, %c0_i32 : i32, i32
  }
  func.func @transform_2(%arg0: i32, %arg1: i32) -> (i32, i32) {
    %c0_i32 = arith.constant 0 : i32
    %c0_i32_0 = arith.constant 0 : i32
    return %arg1, %c0_i32 : i32, i32
  }
  func.func @transform_3(%arg0: i32, %arg1: i32) -> (i32, i32) {
    %c0_i32 = arith.constant 0 : i32
    %c0_i32_0 = arith.constant 0 : i32
    %c0_i32_1 = arith.constant 0 : i32
    return %c0_i32, %c0_i32_0 : i32, i32
  }
  func.func @transform_4(%arg0: i32, %arg1: i32) -> (i32, i32, i32) {
    %c0_i32 = arith.constant 0 : i32
    %c0_i32_0 = arith.constant 0 : i32
    %c0_i32_1 = arith.constant 0 : i32
    return %arg0, %c0_i32, %c0_i32_0 : i32, i32, i32
  }
}

</mosaic_0001>

<bundles_post_ra>
// kernel: tpu_custom_call.1
= control target key start
LH: loop header
LB: loop body
LE: loop exit
PB: predicated region body
PF: predicated region fallthrough
CT: control target
= control target key end

     0   :  { %s1666_s0 = inlined_call_operand.hbm [shape: f32[4,8,256], index: 0, kind: input, shape index: {}]   ;;  %s1667_s1 = inlined_call_operand.hbm [shape: f32[256,256], index: 1, kind: input, shape index: {}]   ;;  %s1668_s2 = inlined_call_operand.hbm [shape: f32[256,128], index: 2, kind: input, shape index: {}]   ;;  %s1669_s3 = inlined_call_operand.vmem [shape: f32[1,256], index: 3, kind: input, shape index: {}]   ;;  %s1670_s4 = inlined_call_operand.hbm [shape: f32[4,8,256], index: 4, kind: output, shape index: {}]  }
   0x1   :  { %1691 = sst [smem:[#allocation26_spill]] %s1667_s1 }
   0x2   :  { %1692 = sst [smem:[#allocation27_spill]] %s1669_s3 }
   0x3   :  { %1693 = sst [smem:[#allocation28_spill]] %s1670_s4 }
   0x4   :  { %9 = vsyncpa [#allocation4], 0 }
   0x5   :  { %11 = vsyncpa [#allocation4 + $0x1], 0 }
   0x6   :  { %12 = vsyncpa [#allocation7], 0 }
   0x7   :  { %14 = vsyncpa [#allocation7 + $0x1], 0 }
   0x8   :  { %15 = vsyncpa [#allocation5], 0 }
   0x9   :  { %17 = vsyncpa [#allocation5 + $0x1], 0  ;;  %s1256_s15 = smov 0   ;;  %s1258_s16 = smov 0  }
   0xa   :  { %s1260_s17 = smov 0   ;;  %s1262_s18 = smov 0  }
   0xb   :  { %s1264_s19 = smov 0   ;;  %s1266_s20 = smov 0  }
   0xc   :  { %s1268_s21 = smov 0   ;;  %s1270_s22 = smov 0  }
   0xd   :  { %s1272_s23 = smov 0   ;;  %s1274_s24 = smov 0  }
   0xe   :  { %s1276_s25 = smov 0   ;;  %s1278_s26 = smov 0  }
   0xf   :  { %s1280_s27 = smov 0   ;;  %s1282_s28 = smov 0  }
  0x10 LB: > { %1694 = sst [smem:[#allocation13_spill]] %s1165_s15  ;;  %s1325_s29 = sadd.s32 4294967295, %s1217_s28   ;;  %s1217_s28 = sphi %s1282_s28, %s23_s28   ;;  %s1213_s27 = sphi %s1280_s27, %s1760_s27   ;;  %s1209_s26 = sphi %s1278_s26, %s1759_s26   ;;  %s1205_s25 = sphi %s1276_s25, %s1758_s25   ;;  %s1201_s24 = sphi %s1274_s24, %s1757_s24   ;;  %s1197_s23 = sphi %s1272_s23, %s1756_s23   ;;  %s1193_s22 = sphi %s1270_s22, %s1755_s22   ;;  %s1189_s21 = sphi %s1268_s21, %s1754_s21   ;;  %s1185_s20 = sphi %s1266_s20, %s1747_s20   ;;  %s1181_s19 = sphi %s1264_s19, %s1753_s19   ;;  %s1177_s18 = sphi %s1262_s18, %s1745_s18   ;;  %s1173_s17 = sphi %s1260_s17, %s1752_s17   ;;  %s1169_s16 = sphi %s1258_s16, %s1751_s16   ;;  %s1165_s15 = sphi %s1256_s15, %s1750_s15  }
  0x11   : > { %1695 = sst [smem:[#allocation14_spill]] %s1169_s16  ;;  %s755_s30 = sadd.s32 4294967294, %s1217_s28  }
  0x12   : > { %1696 = sst [smem:[#allocation15_spill]] %s1181_s19  ;;  %s32_s5 = sadd.s32 1, %s1209_s26 }
  0x13   : > { %1697 = sst [smem:[#allocation16_spill]] %s1185_s20  ;;  %p52_p0 = scmp.eq.s32.totalorder %s1217_s28, 0 }
  0x14   : > { %1698 = sst [smem:[#allocation17_spill]] %s1201_s24  ;;  %p1330_p1 = scmp.ge.s32.totalorder %s32_s5, 2 }
  0x15   : > { %1699 = sst [smem:[#allocation18_spill]] %s1205_s25  ;;  %p1679_p2 = scmp.eq.s32.totalorder %s1325_s29, 0 }
  0x16   : > { %1700 = sst [smem:[#allocation19_spill]] %s1325_s29  ;;  %s70_s7 = sadd.s32 1, %s1185_s20 }
  0x17   : > { %p77_p3 = scmp.ne.s32.totalorder %s1185_s20, %s1181_s19  ;;  %s1762_s5 = smov (%p1330_p1, %s32_s5), 0 }
  0x18   : > { %1702 = sst [smem:[#allocation20_spill]] %s1762_s5  ;;  %p83_p5 = scmp.ne.s32.totalorder %s1181_s19, %s1177_s18 }
  0x19   : > { %p1344_p4 = por %p77_p3, %p52_p0  ;;  %s1351_s9 = ssub.s32 %s1209_s26, %s1762_s5 }
  0x1a   : > { %p153_p6 = scmp.ne.s32.totalorder %s1173_s17, %s1169_s16  ;;  %p68_p7 = scmp.eq.s32.totalorder %s1351_s9, 0 }
  0x1b   : > { %p1358_p8 = por %p83_p5, %p1679_p2  ;;  %p154_p9 = scmp.eq.s32.totalorder %s1325_s29, 3 }
  0x1c   : > { %p159_p10 = scmp.ne.s32.totalorder %s1169_s16, %s1165_s15  ;;  %p160_p12 = scmp.eq.s32.totalorder %s755_s30, 3 }
  0x1d   : > { %s1704_s10 = scalar_select %p1358_p8, 1, 0 }
  0x1e   : > { %s1366_s11 = scalar_select %p68_p7, %s1185_s20, %s70_s7  }
  0x1f   : > { %1705 = sst [smem:[#allocation21_spill]] %s1704_s10  ;;  %p1368_p11 = por %p154_p9, %p153_p6 }
  0x20   : > { %1706 = sst [smem:[#allocation22_spill]] %s1366_s11  ;;  %p1678_p13 = scmp.lt.s32.totalorder %s1217_s28, 4 }
  0x21   : > { %s1707_s12 = scalar_select %p1368_p11, 1, 0 }
  0x22   : > { %p1373_p3 = por %p160_p12, %p159_p10  ;;  %s206_s14 = sand.u32 1, %s1217_s28  }
  0x23   : > { %1708 = sst [smem:[#allocation23_spill]] %s1707_s12  ;;  %s208_s18 = sand.u32 1, %s1185_s20  }
  0x24   : > { %s1709_s13 = scalar_select %p1373_p3, 1, 0 }
  0x25   : > { %s762_s5 = sshll.u32 %s208_s18, 8  ;;  %s784_s4 = sshll.u32 %s1209_s26, 12 }
  0x26   : > { %1710 = sst [smem:[#allocation24_spill]] %s1709_s13  ;;  %s210_s7 = scalar_lea.vmem [#allocation6], %s762_s5 }
  0x27   : > { %s1711_s1 = sld [smem:[#allocation26_spill]]  ;;  %s218_s11 = sshll.u32 %s210_s7, 4  ;;  %s219_s11 = int_to_ptr.vmem [resolvable:$true] %s218_s11 }
  0x28   : > { %p1387_p5 = pnand %p1678_p13, %p1344_p4  ;;  %s766_s13 = sshll.u32 %s208_s18, 7 }
  0x29   : > { %s1391_s12 = scalar_lea.sflag [#allocation7], %s206_s14  ;;  %s998_s20 = scalar_lea.vmem %s219_s11, 4096 }
  0x2a   : > { %p1689_p6 = pneg %p1387_p5  ;;  %p999_p7 = scmp.ne.s32.totalorder %s219_s11, %s998_s20 }
  0x2b   : > { %s1219_s3 = smov [#allocation6]  }
  0x2c   : > { %p1001_p9 = pnand %p999_p7, %p1689_p6 }
  0x2d   : > { %s217_s15 = scalar_lea.hbm %s1711_s1, %s784_s4  ;;  %s1003_s4 = sshll.u32 %s1219_s3, 4  ;;  %s1004_s4 = int_to_ptr.vmem [resolvable:$false] %s1003_s4 }
  0x2e   : > { %p1002_p10 = pneg %p1001_p9  ;;  %s1005_s25 = scalar_lea.vmem %s1004_s4, 8192 }
  0x2f   : > { %p1006_p4 = scmp.lt.s32.totalorder %s219_s11, %s1004_s4  ;;  %p1007_p12 = scmp.lt.s32.totalorder %s1005_s25, %s998_s20 }
  0x31   : > { %p1008_p13 = por %p1007_p12, %p1006_p4 }
  0x33   : > { %p1009_p2 = pnand %p1008_p13, %p1002_p10 }
  0x35   : > { %1012 = shalt.err (!%p1009_p2)
}
  0x36   : > { %s1680_s5 = smov 256   ;;  %s1221_s20 = smov 16  }
  0x37   : > { %855 = dma.hbm_to_vmem [thread:$0]  (!%p1387_p5), %s217_s15, 4096, %s219_s11, %s1391_s12, %s1680_s5, %s1680_s5, %s1221_s20  }
  0x38   : > { %s232_s8 = scalar_lea.vmem [#allocation8], %s766_s13  ;;  %p769_p2 = scmp.ge.s32.totalorder %s1217_s28, 1 }
  0x39   : > { %s1403_s14 = sshll.u32 %s232_s8, 4  ;;  %p247_p13 = scmp.lt.s32.totalorder %s1217_s28, 5  ;;  %s240_s14 = int_to_ptr.vmem [resolvable:$true] %s1403_s14 }
  0x3a   : > { %s35_s7 = sadd.s32 1, %s1213_s27  ;;  %s44_s3 = sadd.s32 1, %s1197_s23 }
  0x3b   : > { %p1407_p7 = pnand %p769_p2, %p247_p13  ;;  %s1764_s7 = smov (!%p1330_p1, %s35_s7), %s1213_s27 }
  0x3c   : > { %p51_p9 = scmp.ne.s32.totalorder %s1197_s23, %s1193_s22  ;;  %p57_p10 = scmp.ne.s32.totalorder %s1193_s22, %s1189_s21 }
  0x3d   : > { %p37_p4 = scmp.ge.s32.totalorder %s1764_s7, 2  ;;  %s143_s15 = sadd.s32 1, %s1173_s17 }
  0x3e   : > { %p1423_p12 = por %p52_p0, %p51_p9  ;;  %p1715_p2 = scmp.eq.s32.totalorder %s1325_s29, 0 }
  0x3f   : > { %s1766_s7 = smov (%p37_p4, %s1764_s7), 0  ;;  %s183_s6 = sand.u32 1, %s1197_s23  }
  0x40   : > { %p1429_p13 = por %p1715_p2, %p57_p10  ;;  %s782_s21 = sshll.u32 %s1213_s27, 2 }
  0x41   : > { %s39_s4 = ssub.s32 %s1213_s27, %s1766_s7  ;;  %s758_s20 = sshll.u32 %s183_s6, 4 }
  0x42   : > { %s1716_s13 = scalar_select %p1429_p13, 1, 0 }
  0x43   : > { %s41_s25 = sor.u32 %s1351_s9, %s39_s4  ;;  %p141_p1 = scmp.eq.s32.totalorder %s39_s4, 0 }
  0x44   : > { %1717 = sst [smem:[#allocation25_spill]] %s1716_s13  ;;  %p42_p0 = scmp.eq.s32.totalorder %s41_s25, 0 }
  0x45   : > { %s1441_s8 = scalar_select %p141_p1, %s1173_s17, %s143_s15  }
  0x46   : > { %s1444_s5 = scalar_select %p42_p0, %s1197_s23, %s44_s3  }
  0x47   : > { %s193_s1 = sadd.s32 %s1209_s26, %s782_s21  ;;  %s187_s16 = scalar_lea.vmem [#allocation3], %s758_s20 }
  0x48   : > { %s761_s24 = sshll.u32 %s193_s1, 7  ;;  %s196_s10 = sshll.u32 %s187_s16, 4  ;;  %s197_s10 = int_to_ptr.vmem [resolvable:$true] %s196_s10 }
  0x49   : > { %s195_s13 = scalar_lea.hbm %s1666_s0, %s761_s24  ;;  %p1718_p9 = scmp.lt.s32.totalorder %s1217_s28, 4 }
  0x4a   : > { %s785_s15 = sshll.u32 %s1209_s26, 11  ;;  %s184_s1 = scalar_lea.sflag [#allocation4], %s183_s6 }
  0x4b   : > { %p1454_p10 = pnand %p1718_p9, %p1423_p12  ;;  %s1462_s21 = scalar_lea.hbm %s1668_s2, %s785_s15 }
  0x4c   : > { %s1026_s16 = scalar_lea.vmem %s197_s10, 256  ;;  %s1222_s19 = smov [#allocation3]  }
  0x4d   : > { %p1015_p4 = pneg %p1454_p10  ;;  %p1027_p2 = scmp.ne.s32.totalorder %s197_s10, %s1026_s16 }
  0x4e   : > { %s1031_s24 = sshll.u32 %s1222_s19, 4  ;;  %s1032_s24 = int_to_ptr.vmem [resolvable:$false] %s1031_s24 }
  0x4f   : > { %p1029_p1 = pnand %p1027_p2, %p1015_p4  ;;  %s1033_s29 = scalar_lea.vmem %s1032_s24, 512 }
  0x50   : > { %p1034_p12 = scmp.lt.s32.totalorder %s197_s10, %s1032_s24  ;;  %p1035_p9 = scmp.lt.s32.totalorder %s1033_s29, %s1026_s16 }
  0x51   : > { %p1030_p0 = pneg %p1029_p1 }
  0x52   : > { %p1036_p6 = por %p1035_p9, %p1034_p12 }
  0x54   : > { %p1037_p3 = pnand %p1036_p6, %p1030_p0 }
  0x56   : > { %1040 = shalt.err (!%p1037_p3)
}
  0x57   : > { %s1223_s11 = smov 128   ;;  %s1224_s6 = smov 8  }
  0x58   : > { %s1720_s25 = smov 256   ;;  %s1054_s20 = scalar_lea.vmem %s240_s14, 2048 }
  0x59   : > { %852 = dma.hbm_to_vmem [thread:$0]  (!%p1454_p10), %s195_s13, 256, %s197_s10, %s184_s1, %s1720_s25, %s1223_s11, %s1224_s6  }
  0x5a   : > { %p1055_p4 = scmp.ne.s32.totalorder %s240_s14, %s1054_s20  ;;  %p1721_p2 = pneg %p1387_p5 }
  0x5b   : > { %s1225_s15 = smov [#allocation8]  }
  0x5c   : > { %p1057_p1 = pnand %p1055_p4, %p1721_p2  ;;  %s1059_s4 = sshll.u32 %s1225_s15, 4  ;;  %s1060_s4 = int_to_ptr.vmem [resolvable:$false] %s1059_s4 }
  0x5d   : > { %s1061_s3 = scalar_lea.vmem %s1060_s4, 4096  ;;  %p1062_p3 = scmp.lt.s32.totalorder %s240_s14, %s1060_s4 }
  0x5e   : > { %p1058_p11 = pneg %p1057_p1  ;;  %p1063_p6 = scmp.lt.s32.totalorder %s1061_s3, %s1054_s20 }
  0x60   : > { %p1064_p0 = por %p1063_p6, %p1062_p3 }
  0x62   : > { %p1065_p12 = pnand %p1064_p0, %p1058_p11 }
  0x64   : > { %1068 = shalt.err (!%p1065_p12)
}
  0x65   : > { %858 = dma.hbm_to_vmem [thread:$0]  (!%p1387_p5), %s1462_s21, 2048, %s240_s14, %s1391_s12, %s1223_s11, %s1223_s11, %s1224_s6  }
  0x66   : > { %251 = sbr.rel (%p1407_p7) target bundleno = 407 (0x197), region = 36  ;;  %s253_s13 = sand.u32 (!%p1407_p7), 1, %s1193_s22  }
  0x67   : > { %s1480_s9 = sshll.u32 (!%p1407_p7), %s253_s13, 4  ;;  %s254_s1 = scalar_lea.sflag (!%p1407_p7), [#allocation4], %s253_s13 }
  0x68   : > { %s257_s16 = scalar_lea.vmem (!%p1407_p7), [#allocation3], %s1480_s9 }
  0x6b   : > { %1152 = dma.done.wait (%p1429_p13), %s254_s1, 256  }
  0x6c   : > { %1154 = vsyncadd (%p1429_p13), %s254_s1, 4294967040  ;;  %s1723_s30 = sld [smem:[#allocation19_spill]] }
  0x6d   : > { %s1724_s19 = sld [smem:[#allocation15_spill]] }
  0x72   : > { %s262_s12 = sand.u32 1, %s1723_s30  }
  0x73   : > { %s264_s14 = sand.u32 1, %s1724_s19   ;;  %s263_s21 = scalar_lea.sflag [#allocation7], %s262_s12 }
  0x74   : > { %s771_s18 = sshll.u32 %s264_s14, 8 }
  0x75   : > { %s1489_s29 = scalar_lea.vmem [#allocation6], %s771_s18 }
  0x76   : > { %1156 = dma.done.wait (%p1358_p8), %s263_s21, 6144  }
  0x77   : > { %1158 = vsyncadd (%p1358_p8), %s263_s21, 4294961152  ;;  %s1726_s11 = sld [smem:[#allocation14_spill]]  ;;  %s772_s20 = sshll.u32 %s264_s14, 7  ;;  %v1226_v0 = vmov 0.0   ;;  %v347_v1 = vld [vmem:[%s1489_s29 + $0xf8] sm:$0xff]  ;;  %v346_v3 = vld [vmem:[%s1489_s29 + $0xf0] sm:$0xff]  ;;  %v518_v51 = vlaneseq }
  0x78   : > { %412 = vmatprep.mubr.f32.mxu0 %v1226_v0  ;;  %s1502_s15 = scalar_lea.vmem [#allocation8], %s772_s20  ;;  %348 = vmatprep.subr.mxu0 %v347_v1  ;;  %v345_v4 = vld [vmem:[%s1489_s29 + $0xe8] sm:$0xff]  ;;  %v344_v6 = vld [vmem:[%s1489_s29 + $0xe0] sm:$0xff]  ;;  %v343_v7 = vld [vmem:[%s1489_s29 + $0xd8] sm:$0xff]  ;;  %s1731_s3 = sld [smem:[#allocation17_spill]] }
  0x79   : > { %v440_v2 = vld [vmem:[%s1502_s15 + $0x78] sm:$0xff]  ;;  %v439_v5 = vld [vmem:[%s1502_s15 + $0x70] sm:$0xff]  ;;  %349 = vmatpush1.msra.mxu0 %v346_v3  ;;  %v438_v8 = vld [vmem:[%s1502_s15 + $0x68] sm:$0xff]  ;;  %v519_v52 = vshrl.u32 %v518_v51, 7 }
  0x7a   : > { %806 = vmatprep.subr.mxu1 %v440_v2  ;;  %350 = vmatprep.subr.mxu0 %v345_v4  ;;  %v342_v9 = vld [vmem:[%s1489_s29 + $0xd0] sm:$0xff]  ;;  %v341_v10 = vld [vmem:[%s1489_s29 + $0xc8] sm:$0xff]  ;;  %v437_v11 = vld [vmem:[%s1502_s15 + $0x60] sm:$0xff] }
  0x7b   : > { %807 = vmatpush3.msra.mxu1 %v440_v2  ;;  %351 = vmatpush1.msra.mxu0 %v344_v6  ;;  %v340_v12 = vld [vmem:[%s1489_s29 + $0xc0] sm:$0xff]  ;;  %v339_v13 = vld [vmem:[%s1489_s29 + $0xb8] sm:$0xff]  ;;  %v338_v15 = vld [vmem:[%s1489_s29 + $0xb0] sm:$0xff]  ;;  %v523_v53 = vadd.s32 8, %v519_v52  ;;  %v528_v55 = vand.u32 7, %v519_v52  ;;  %vm520_vm0 = vcmp.lt.s32.totalorder %v519_v52, 7 }
  0x7c   : > { %808 = vmatprep.subr.mxu1 %v439_v5  ;;  %352 = vmatprep.subr.mxu0 %v343_v7  ;;  %v436_v14 = vld [vmem:[%s1502_s15 + $0x58] sm:$0xff]  ;;  %v337_v16 = vld [vmem:[%s1489_s29 + $0xa8] sm:$0xff]  ;;  %v435_v17 = vld [vmem:[%s1502_s15 + $0x50] sm:$0xff] }
  0x7d   : > { %s307_s6 = sand.u32 1, %s1726_s11   ;;  %809 = vmatpush3.msra.mxu1 %v439_v5  ;;  %353 = vmatpush1.msra.mxu0 %v342_v9  ;;  %v336_v18 = vld [vmem:[%s1489_s29 + $0xa0] sm:$0xff]  ;;  %v335_v19 = vld [vmem:[%s1489_s29 + $0x98] sm:$0xff]  ;;  %v434_v20 = vld [vmem:[%s1502_s15 + $0x48] sm:$0xff]  ;;  %v535_v56 = vand.u32 7, %v523_v53  ;;  %vm1556_vm1 = vcmp.lt.s32.totalorder %v528_v55, 7 }
  0x7e   : > { %s1498_s25 = sshll.u32 %s307_s6, 5  ;;  %810 = vmatprep.subr.mxu1 %v438_v8  ;;  %354 = vmatprep.subr.mxu0 %v341_v10  ;;  %v334_v21 = vld [vmem:[%s1489_s29 + $0x90] sm:$0xff]  ;;  %v333_v22 = vld [vmem:[%s1489_s29 + $0x88] sm:$0xff]  ;;  %v433_v23 = vld [vmem:[%s1502_s15 + $0x40] sm:$0xff]  ;;  %p774_p8 = scmp.ne.s32.totalorder %s1731_s3, 0 }
  0x7f   : > { %811 = vmatpush3.msra.mxu1 %v438_v8  ;;  %355 = vmatpush1.msra.mxu0 %v340_v12  ;;  %v332_v24 = vld [vmem:[%s1489_s29 + $0x80] sm:$0xff]  ;;  %v331_v25 = vld [vmem:[%s1489_s29 + $0x78] sm:$0xff]  ;;  %v330_v27 = vld [vmem:[%s1489_s29 + $0x70] sm:$0xff]  ;;  %vm1560_vm2 = vcmp.lt.s32.totalorder %v535_v56, 7  ;;  %s1569_s4 = scalar_lea.vmem [#allocation9], %s1498_s25 }
  0x80   : > { %812 = vmatprep.subr.mxu1 %v437_v11  ;;  %356 = vmatprep.subr.mxu0 %v339_v13  ;;  %v432_v26 = vld [vmem:[%s1502_s15 + $0x38] sm:$0xff]  ;;  %v329_v28 = vld [vmem:[%s1489_s29 + $0x68] sm:$0xff]  ;;  %v431_v29 = vld [vmem:[%s1502_s15 + $0x30] sm:$0xff] }
  0x81   : > { %813 = vmatpush3.msra.mxu1 %v437_v11  ;;  %357 = vmatpush1.msra.mxu0 %v338_v15  ;;  %v328_v30 = vld [vmem:[%s1489_s29 + $0x60] sm:$0xff]  ;;  %v327_v31 = vld [vmem:[%s1489_s29 + $0x58] sm:$0xff]  ;;  %v430_v32 = vld [vmem:[%s1502_s15 + $0x28] sm:$0xff] }
  0x82   : > { %814 = vmatprep.subr.mxu1 %v436_v14  ;;  %358 = vmatprep.subr.mxu0 %v337_v16  ;;  %v326_v33 = vld [vmem:[%s1489_s29 + $0x50] sm:$0xff]  ;;  %v325_v34 = vld [vmem:[%s1489_s29 + $0x48] sm:$0xff]  ;;  %v429_v35 = vld [vmem:[%s1502_s15 + $0x20] sm:$0xff] }
  0x83   : > { %815 = vmatpush3.msra.mxu1 %v436_v14  ;;  %359 = vmatpush1.msra.mxu0 %v336_v18  ;;  %v324_v36 = vld [vmem:[%s1489_s29 + $0x40] sm:$0xff]  ;;  %v323_v37 = vld [vmem:[%s1489_s29 + $0x38] sm:$0xff]  ;;  %v322_v39 = vld [vmem:[%s1489_s29 + $0x30] sm:$0xff] }
  0x84   : > { %816 = vmatprep.subr.mxu1 %v435_v17  ;;  %360 = vmatprep.subr.mxu0 %v335_v19  ;;  %v428_v38 = vld [vmem:[%s1502_s15 + $0x18] sm:$0xff]  ;;  %v321_v40 = vld [vmem:[%s1489_s29 + $0x28] sm:$0xff]  ;;  %v427_v41 = vld [vmem:[%s1502_s15 + $0x10] sm:$0xff] }
  0x85   : > { %817 = vmatpush3.msra.mxu1 %v435_v17  ;;  %361 = vmatpush1.msra.mxu0 %v334_v21  ;;  %v320_v42 = vld [vmem:[%s1489_s29 + $0x20] sm:$0xff]  ;;  %v319_v43 = vld [vmem:[%s1489_s29 + $0x18] sm:$0xff]  ;;  %v426_v44 = vld [vmem:[%s1502_s15 + $0x8] sm:$0xff] }
  0x86   : > { %818 = vmatprep.subr.mxu1 %v434_v20  ;;  %362 = vmatprep.subr.mxu0 %v333_v22  ;;  %v318_v45 = vld [vmem:[%s1489_s29 + $0x10] sm:$0xff]  ;;  %v317_v46 = vld [vmem:[%s1489_s29 + $0x8] sm:$0xff]  ;;  %v425_v47 = vld [vmem:[%s1502_s15] sm:$0xff] }
  0x87   : > { %819 = vmatpush3.msra.mxu1 %v434_v20  ;;  %363 = vmatpush1.msra.mxu0 %v332_v24  ;;  %v316_v48 = vld [vmem:[%s1489_s29] sm:$0xff]  ;;  %v315_v50 = vld [vmem:[%s257_s16 + $0x8] sm:$0xff] }
  0x88   : > { %820 = vmatprep.subr.mxu1 %v433_v23  ;;  %364 = vmatprep.subr.mxu0 %v331_v25  ;;  %v314_v49 = vld [vmem:[%s257_s16] sm:$0xff] }
  0x89   : > { %821 = vmatpush3.msra.mxu1 %v433_v23  ;;  %365 = vmatpush1.msra.mxu0 %v330_v27 }
  0x8a   : > { %822 = vmatprep.subr.mxu1 %v432_v26  ;;  %366 = vmatprep.subr.mxu0 %v329_v28 }
  0x8b   : > { %823 = vmatpush3.msra.mxu1 %v432_v26  ;;  %367 = vmatpush1.msra.mxu0 %v328_v30 }
  0x8c   : > { %824 = vmatprep.subr.mxu1 %v431_v29  ;;  %368 = vmatprep.subr.mxu0 %v327_v31 }
  0x8d   : > { %825 = vmatpush3.msra.mxu1 %v431_v29  ;;  %369 = vmatpush1.msra.mxu0 %v326_v33 }
  0x8e   : > { %826 = vmatprep.subr.mxu1 %v430_v32  ;;  %370 = vmatprep.subr.mxu0 %v325_v34 }
  0x8f   : > { %827 = vmatpush3.msra.mxu1 %v430_v32  ;;  %371 = vmatpush1.msra.mxu0 %v324_v36 }
  0x90   : > { %828 = vmatprep.subr.mxu1 %v429_v35  ;;  %372 = vmatprep.subr.mxu0 %v323_v37 }
  0x91   : > { %829 = vmatpush3.msra.mxu1 %v429_v35  ;;  %373 = vmatpush1.msra.mxu0 %v322_v39 }
  0x92   : > { %830 = vmatprep.subr.mxu1 %v428_v38  ;;  %374 = vmatprep.subr.mxu0 %v321_v40 }
  0x93   : > { %831 = vmatpush3.msra.mxu1 %v428_v38  ;;  %375 = vmatpush1.msra.mxu0 %v320_v42 }
  0x94   : > { %832 = vmatprep.subr.mxu1 %v427_v41  ;;  %376 = vmatprep.subr.mxu0 %v319_v43 }
  0x95   : > { %833 = vmatpush3.msra.mxu1 %v427_v41  ;;  %377 = vmatpush1.msra.mxu0 %v318_v45 }
  0x96   : > { %834 = vmatprep.subr.mxu1 %v426_v44  ;;  %378 = vmatprep.subr.mxu0 %v317_v46 }
  0x97   : > { %835 = vmatpush3.msra.mxu1 %v426_v44  ;;  %379 = vmatpush1.msra.mxu0 %v316_v48 }
  0x98   : > { %836 = vmatprep.subr.mxu1 %v425_v47  ;;  %838 = vmatprep.mubr.f32.mxu1 %v314_v49 }
  0x99   : > { %837 = vmatpush3.msra.mxu1 %v425_v47  ;;  %413 = vmatmul.mubr.f32.vlgmr.msra.gmra.mxu0 %v314_v49 }
  0x9a   : > { %839 = vmatmul.mubr.f32.vlgmr.msra.gmra.mxu1 %v315_v50  ;;  %418 = vmatprep.mubr.f32.mxu0 %v1226_v0 }
  0x9d   : > { %419 = vmatmul.mubr.f32.gmra.mxu0 %v315_v50 }
 0x159   : > { %v414_v54 = vpop.f32.mrf.mxu0 }
 0x15a   : > { %v840_v57 = vpop.f32.mrf.mxu1 }
 0x15b   : > { %v416_v58 = vpop.f32.mrf.mxu0  ;;  %v517_v60 = vrot.slane %v840_v57, 1 }
 0x15c   : > { %v507_v59 = vpop.f32.mrf.mxu1  ;;  %559 = sbr.rel (%p774_p8) target bundleno = 356 (0x164), region = 52 }
 0x15d   : > { %v516_v61 = vrot.slane %v507_v59, 1  ;;  %v420_v0 = vpop.f32.mrf.mxu0 }
 0x15f   : > { %v521_v1 = vsel %vm520_vm0, %v516_v61, %v517_v60  ;;  %v522_v2 = vsel %vm520_vm0, %v517_v60, %v516_v61  ;;  %v422_v3 = vpop.f32.mrf.mxu0 }
 0x160   : > { %v554_v4 = vsel %vm1556_vm1, %v521_v1, 0.0  ;;  %v555_v5 = vsel %vm1560_vm2, %v522_v2, 0.0 }
 0x161   : > { %v1227_v6 = vmov 0.0  }
 0x162   : > { %560 = vst [vmem:[#allocation2 + $0x10] sm:$0xff] %v1227_v6  ;;  %561 = vst [vmem:[#allocation2] sm:$0xff] %v1227_v6 }
 0x163   : > { %562 = vst [vmem:[#allocation2 + $0x18] sm:$0xff] %v1227_v6  ;;  %563 = vst [vmem:[#allocation2 + $0x8] sm:$0xff] %v1227_v6 }
 0x164 PF: > { %v572_v10 = vadd.f32 %v554_v4, %v416_v58  ;;  %v573_v11 = vadd.f32 %v555_v5, %v422_v3  ;;  %s1732_s10 = sld [smem:[#allocation17_spill]] }
 0x169   : > { %v564_v7 = vld [vmem:[#allocation2 + $0x10] sm:$0xff]  ;;  %v570_v9 = vld [vmem:[#allocation2] sm:$0xff] }
 0x16a   : > { %v565_v8 = vld [vmem:[#allocation2 + $0x18] sm:$0xff]  ;;  %v566_v12 = vadd.f32 %v564_v7, %v414_v54  ;;  %v571_v14 = vld [vmem:[#allocation2 + $0x8] sm:$0xff]  ;;  %v574_v15 = vadd.f32 %v572_v10, %v570_v9  ;;  %p775_p11 = scmp.ne.s32.totalorder %s1732_s10, 1 }
 0x16b   : > { %v567_v13 = vadd.f32 %v565_v8, %v420_v0  ;;  %v575_v16 = vadd.f32 %v573_v11, %v571_v14  ;;  %s1733_s1 = sld [smem:[#allocation27_spill]] (!%p775_p11) }
 0x16c   : > { %568 = vst [vmem:[#allocation2 + $0x10] sm:$0xff] %v566_v12  ;;  %576 = vst [vmem:[#allocation2] sm:$0xff] %v574_v15  ;;  %581 = sbr.rel (%p775_p11) target bundleno = 379 (0x17b), region = 56 }
 0x16d   : > { %569 = vst [vmem:[#allocation2 + $0x18] sm:$0xff] %v567_v13  ;;  %577 = vst [vmem:[#allocation2 + $0x8] sm:$0xff] %v575_v16 }
 0x171   : > { %v586_v18 = vld [vmem:[%s1733_s1] sm:$0x3]  ;;  %v590_v19 = vsub.s32 0, %v519_v52  ;;  %v594_v20 = vsub.s32 1, %v519_v52 }
 0x173   : > { %v582_v17 = vld [vmem:[#allocation2 + $0x10] sm:$0xff]  ;;  %v583_v22 = vld [vmem:[#allocation2] sm:$0xff]  ;;  %v591_v24 = vrot.slane %v586_v18, %v590_v19  ;;  %v595_v25 = vrot.slane %v586_v18, %v594_v20 }
 0x174   : > { %v584_v21 = vld [vmem:[#allocation2 + $0x18] sm:$0xff]  ;;  %v585_v23 = vld [vmem:[#allocation2 + $0x8] sm:$0xff] }
 0x175   : > { %v598_v26 = vadd.f32 %v591_v24, %v582_v17  ;;  %v600_v27 = vadd.f32 %v591_v24, %v584_v21  ;;  %v599_v28 = vadd.f32 %v595_v25, %v583_v22  ;;  %v601_v29 = vadd.f32 %v595_v25, %v585_v23 }
 0x177   : > { %v602_v30 = vmax.f32 %v598_v26, 0.0  ;;  %v603_v31 = vmax.f32 %v600_v27, 0.0  ;;  %v604_v32 = vmax.f32 %v599_v28, 0.0  ;;  %v605_v33 = vmax.f32 %v601_v29, 0.0 }
 0x179   : > { %606 = vst [vmem:[%s1569_s4] sm:$0xff] %v602_v30  ;;  %607 = vst [vmem:[%s1569_s4 + $0x10] sm:$0xff] %v603_v31 }
 0x17a   : > { %608 = vst [vmem:[%s1569_s4 + $0x8] sm:$0xff] %v604_v32  ;;  %609 = vst [vmem:[%s1569_s4 + $0x18] sm:$0xff] %v605_v33 }
 0x17b PF: > { %s1734_s16 = sld [smem:[#allocation18_spill]]  ;;  %s625_s11 = sshll.u32 %s1569_s4, 4  ;;  %s1587_s11 = int_to_ptr.vmem [resolvable:$true] %s625_s11 }
 0x17c   : > { %s1736_s19 = sld [smem:[#allocation23_spill]]  ;;  %s1591_s25 = scalar_lea.sflag [#allocation5], %s307_s6 }
 0x17d   : > { %s1737_s18 = sld [smem:[#allocation28_spill]]  ;;  %s1069_s20 = scalar_lea.vmem %s1587_s11, 512 }
 0x17e   : > { %p1070_p5 = scmp.ne.s32.totalorder %s1587_s11, %s1069_s20  ;;  %s1228_s15 = smov [#allocation9]  }
 0x17f   : > { %s1073_s3 = sshll.u32 %s1228_s15, 4  ;;  %s1074_s3 = int_to_ptr.vmem [resolvable:$false] %s1073_s3 }
 0x180   : > { %s1075_s10 = scalar_lea.vmem %s1074_s3, 1024  ;;  %p1076_p9 = scmp.lt.s32.totalorder %s1587_s11, %s1074_s3 }
 0x181   : > { %s787_s24 = sshll.u32 %s1734_s16, 9  ;;  %p1077_p4 = scmp.lt.s32.totalorder %s1075_s10, %s1069_s20 }
 0x182   : > { %p1739_p7 = scmp.ne.s32.totalorder %s1736_s19, 0 }
 0x183   : > { %s1738_s29 = smov %s1737_s18  ;;  %s1584_s21 = scalar_lea.hbm %s1737_s18, %s787_s24 }
 0x184   : > { %p1071_p13 = pnand %p1070_p5, %p1739_p7  ;;  %p1078_p2 = por %p1077_p4, %p1076_p9 }
 0x186   : > { %p1072_p10 = pneg %p1071_p13 }
 0x188   : > { %p1079_p1 = pnand %p1078_p2, %p1072_p10 }
 0x18a   : > { %1082 = shalt.err (!%p1079_p1)
}
 0x18b   : > { %s1083_s6 = scalar_lea.hbm %s1584_s21, 512  ;;  %s1087_s9 = scalar_lea.hbm %s1738_s29, 1024 }
 0x18c   : > { %p1084_p3 = scmp.ne.s32.totalorder %s1584_s21, %s1083_s6  ;;  %p1088_p12 = scmp.lt.s32.totalorder %s1584_s21, %s1738_s29 }
 0x18d   : > { %p1089_p8 = scmp.lt.s32.totalorder %s1087_s9, %s1083_s6 }
 0x18e   : > { %p1085_p6 = pnand %p1084_p3, %p1739_p7 }
 0x18f   : > { %p1090_p11 = por %p1089_p8, %p1088_p12 }
 0x190   : > { %p1086_p0 = pneg %p1085_p6 }
 0x192   : > { %p1091_p5 = pnand %p1090_p11, %p1086_p0 }
 0x194   : > { %1094 = shalt.err (!%p1091_p5)
}
 0x195   : > { %s1229_s30 = smov 256   ;;  %s1230_s24 = smov 16  }
 0x196   : > { %847 = dma.vmem_to_hbm [thread:$0]  (%p1739_p7), %s1587_s11, 512, %s1584_s21, %s1591_s25, %s1229_s30, %s1229_s30, %s1230_s24  }
 0x197 PF: > { %s1740_s12 = sld [smem:[#allocation13_spill]]  ;;  %p864_p13 = scmp.ge.s32.totalorder %s1217_s28, 2 }
 0x198   : > { %s1741_s14 = sld [smem:[#allocation24_spill]] }
 0x19d   : > { %s640_s18 = sand.u32 1, %s1740_s12  }
 0x19e   : > { %p1742_p10 = scmp.ne.s32.totalorder %s1741_s14, 0  ;;  %s641_s20 = scalar_lea.sflag [#allocation5], %s640_s18 }
 0x1a0   : > { %p860_p9 = pnand %p864_p13, %p1742_p10 }
 0x1a2   : > { %p861_p4 = pneg %p860_p9 }
 0x1a4   : > { %1160 = dma.done.wait (%p861_p4), %s641_s20, 512  }
 0x1a5   : > { %1162 = vsyncadd (%p861_p4), %s641_s20, 4294966784  ;;  %s23_s28 = sadd.s32 1, %s1217_s28   ;;  %s1744_s19 = sld [smem:[#allocation14_spill]] }
 0x1a6   : > { %p1619_p2 = scmp.ge.s32.totalorder %s23_s28, 6   ;;  %s1745_s18 = sld [smem:[#allocation15_spill]] }
 0x1a7   : > { %s1746_s21 = sld [smem:[#allocation16_spill]]  ;;  %s1751_s16 = smov %s1173_s17 }
 0x1a8   : > { %s1747_s20 = sld [smem:[#allocation22_spill]]  ;;  %s1752_s17 = smov %s1441_s8 }
 0x1a9   : > { %s1748_s11 = sld [smem:[#allocation20_spill]]  ;;  %s1757_s24 = smov %s1209_s26 }
 0x1aa   : > { %s1758_s25 = smov %s1213_s27  ;;  %s1760_s27 = smov %s1766_s7 }
 0x1ab   : > { %s1750_s15 = smov %s1744_s19  ;;  %22 = sbr.rel (!%p1619_p2) target bundleno = 16 (0x10), region = 113 }
 0x1ad   : > { %s1753_s19 = smov %s1746_s21  ;;  %s1754_s21 = smov %s1193_s22 }
 0x1ae   : > { %s1755_s22 = smov %s1197_s23  ;;  %s1756_s23 = smov %s1444_s5 }
 0x1af   : > { %s1759_s26 = smov %s1748_s11 }
 0x1b0   :  { %646 = vsyncpa [#allocation4], 1 }
 0x1b1   :  { %648 = vsyncpa [#allocation4 + $0x1], 1 }
 0x1b2   :  { %649 = vsyncpa [#allocation7], 1 }
 0x1b3   :  { %651 = vsyncpa [#allocation7 + $0x1], 1 }
 0x1b4   :  { %652 = vsyncpa [#allocation5], 1 }
 0x1b5   :  { %654 = vsyncpa [#allocation5 + $0x1], 1 }

</bundles_post_ra>
